<compile_context>
chip_gen: v7x
topology: tpu7x:2x2x1
jax: 0.10.0
libtpu: 0.0.40
codegen_flags: <defaults>
</compile_context>

<pallas_src>
import jax
import jax.numpy as jnp
from jax.experimental import pallas as pl
from jax.experimental.pallas import tpu as pltpu


# ---------------------------------------------------------------------------
# Kernel: read-modify-write only a small row window of each image plane.
# ---------------------------------------------------------------------------
def _add_patch_rows_kernel(x_hbm, start_ref, prompt_ref, o_hbm, buf, sems):
    # x_hbm / o_hbm : (B*C, H, W) in HBM; output aliases x.
    # start_ref     : SMEM int32[1] -> first image row of the DMA window.
    # prompt_ref    : VMEM (TB*C, WIN, W) prompt rows, resident across grid.
    # buf           : VMEM (TB*C, WIN, W) scratch slab.
    tbc, win, _ = buf.shape
    i = pl.program_id(0)
    rs = start_ref[0]
    base = i * tbc

    in_cp = pltpu.make_async_copy(
        x_hbm.at[pl.ds(base, tbc), pl.ds(rs, win), :], buf, sems.at[0])
    in_cp.start()
    in_cp.wait()

    buf[...] = buf[...] + prompt_ref[...]

    out_cp = pltpu.make_async_copy(
        buf, o_hbm.at[pl.ds(base, tbc), pl.ds(rs, win), :], sems.at[1])
    out_cp.start()
    out_cp.wait()


# ---------------------------------------------------------------------------
# Wrapper.
# ---------------------------------------------------------------------------
def _choose_batch_tile(batch, per_image_bytes, target_bytes=2 << 20, min_grid=8):
    """Largest divisor of `batch` whose per-step slab fits `target_bytes` while
    keeping at least min(min_grid, batch) grid steps (>=2 steps lets
    dimension_semantics=("parallel",) use both TensorCores on v7x).  Never
    falls back to the full batch."""
    min_steps = min(min_grid, batch)
    best = 1
    for tb in range(1, batch + 1):
        if batch % tb != 0:
            continue
        if tb > 1 and tb * per_image_bytes > target_bytes:
            continue
        if batch // tb < min_steps:
            continue
        best = tb
    return best


def random_patch_prompter(x, patch, offsets):
    """x: (B, C, H, W); patch: (1, C, P, P); offsets: int32[2] = (x_, y_)."""
    B, C, H, W = x.shape
    P = patch.shape[-1]
    dtype = x.dtype
    item = jnp.dtype(dtype).itemsize

    x_off = offsets[0].astype(jnp.int32)
    y_off = offsets[1].astype(jnp.int32)

    # Static, sublane-aligned row window [row_start, row_start + win) that is
    # guaranteed to contain the patch rows [x_, x_+P).  win is static,
    # row_start is traced (and a multiple of 8 whenever H allows it).
    win = min(H, (-(-(P + 7) // 8)) * 8)
    row_start = jnp.minimum((x_off // 8) * 8, H - win).astype(jnp.int32)

    # Prompt rows for that window, placed at (x_ - row_start, y_): plain JAX,
    # no builder kernel (review item: tiny problem, skip the MXU + extra
    # kernel launch + HBM round trip).
    prompt_win = jnp.zeros((C, win, W), dtype)
    prompt_win = jax.lax.dynamic_update_slice(
        prompt_win, patch[0].astype(dtype), (0, x_off - row_start, y_off))

    # Batch tiling (divisor of B -> no ragged tail; grid >= min(8, B) steps).
    tb = _choose_batch_tile(B, C * win * W * item)
    tbc = tb * C
    grid = (B // tb,)

    prompt_tiled = jnp.tile(prompt_win, (tb, 1, 1))  # (tbc, win, W)
    x_flat = x.reshape(B * C, H, W)                  # free reshape

    # Actual VMEM footprint (slab + resident prompt, padded to (8,128) tiles)
    # plus generous slack; well under the 64 MiB physical VMEM of v7x.
    pad_slab = tbc * (-(-win // 8) * 8) * (-(-W // 128) * 128) * item
    vmem_bytes = int(min(64 << 20, max(8 << 20, 4 * pad_slab + (4 << 20))))

    out_flat = pl.pallas_call(
        _add_patch_rows_kernel,
        out_shape=jax.ShapeDtypeStruct((B * C, H, W), dtype),
        grid=grid,
        in_specs=[
            pl.BlockSpec(memory_space=pl.ANY),                  # x, stays in HBM
            pl.BlockSpec(memory_space=pltpu.MemorySpace.SMEM),  # row_start scalar
            pl.BlockSpec((tbc, win, W), lambda i: (0, 0, 0)),   # resident prompt
        ],
        out_specs=pl.BlockSpec(memory_space=pl.ANY),            # aliased to x
        scratch_shapes=[
            pltpu.VMEM((tbc, win, W), dtype),
            pltpu.SemaphoreType.DMA((2,)),
        ],
        input_output_aliases={0: 0},  # untouched region of x never moves
        compiler_params=pltpu.CompilerParams(
            dimension_semantics=("parallel",),
            vmem_limit_bytes=vmem_bytes,
        ),
        cost_estimate=pl.CostEstimate(
            flops=B * C * win * W,
            transcendentals=0,
            bytes_accessed=2 * B * C * win * W * item + tbc * win * W * item,
        ),
    )(x_flat, row_start.reshape(1), prompt_tiled)

    return out_flat.reshape(B, C, H, W)


if __name__ == "__main__":
    # Small shapes consistent with the module: image_size=16, prompt_size=4.
    isize, psize, batch = 16, 4, 2

    key = jax.random.PRNGKey(0)
    kx, kp, kox, koy = jax.random.split(key, 4)

    x = jax.random.normal(kx, (batch, 3, isize, isize), dtype=jnp.float32)
    # Deterministic stand-in for the torch.randn patch parameter.
    patch = jax.random.normal(kp, (1, 3, psize, psize), dtype=jnp.float32)

    # Deterministic stand-in for np.random.choice(isize - psize) in forward().
    x_off = jax.random.randint(kox, (), 0, isize - psize, dtype=jnp.int32)
    y_off = jax.random.randint(koy, (), 0, isize - psize, dtype=jnp.int32)
    offsets = jnp.stack([x_off, y_off]).astype(jnp.int32)

    # Pure-JAX reference of the PyTorch forward.
    prompt_full = jnp.zeros((1, 3, isize, isize), jnp.float32)
    prompt_full = jax.lax.dynamic_update_slice(
        prompt_full, patch, (0, 0, x_off, y_off))
    ref = x + prompt_full

    out = random_patch_prompter(x, patch, offsets)
    out = jax.block_until_ready(out)

    assert out.shape == x.shape
    err = float(jnp.max(jnp.abs(out - ref)))
    assert jnp.allclose(out, ref, atol=1e-5), err

    print("KERNEL_OK")
</pallas_src>

<mosaic_0001>
module attributes {stable_mosaic.version = 11 : i64} {
  func.func @_add_patch_rows_kernel(%arg0: i32, %arg1: memref<6x16x16xf32, #tpu.memory_space<any>>, %arg2: memref<1xi32, #tpu.memory_space<smem>>, %arg3: memref<3x16x16xf32, #tpu.memory_space<vmem>>, %arg4: memref<6x16x16xf32, #tpu.memory_space<any>>, %arg5: memref<3x16x16xf32, #tpu.memory_space<vmem>>, %arg6: memref<2x!tpu.dma_semaphore, #tpu.memory_space<semaphore_mem>>) attributes {dimension_semantics = [#tpu.dimension_semantics<parallel>], iteration_bounds = array<i64: 2>, scalar_prefetch = 0 : i64, scratch_operands = 2 : i64, tpu.core_type = #tpu.core_type<tc>, window_params = [{}, {transform_indices = @transform_1, window_bounds = array<i64: 1>}, {pipeline_mode = #tpu.pipeline_mode<synchronous>, transform_indices = @transform_2, window_bounds = array<i64: 3, 16, 16>}, {}]} {
    %c0 = arith.constant 0 : index
    %0 = memref.load %arg2[%c0] : memref<1xi32, #tpu.memory_space<smem>>
    %c3_i32 = arith.constant 3 : i32
    %1 = arith.muli %arg0, %c3_i32 : i32
    %c0_i32 = arith.constant 0 : i32
    %c0_i32_0 = arith.constant 0 : i32
    %2 = tpu.memref_slice %arg1[%1, %0, %c0_i32_0] : memref<6x16x16xf32, #tpu.memory_space<any>> -> memref<3x16x16xf32, #tpu.memory_space<any>>
    %3 = tpu.memref_slice %arg6[%c0_i32] : memref<2x!tpu.dma_semaphore, #tpu.memory_space<semaphore_mem>> -> memref<1x!tpu.dma_semaphore, #tpu.memory_space<semaphore_mem>>
    %4 = tpu.memref_squeeze %3 : memref<1x!tpu.dma_semaphore, #tpu.memory_space<semaphore_mem>> -> memref<!tpu.dma_semaphore, #tpu.memory_space<semaphore_mem>>
    tpu.enqueue_dma source(%2 : memref<3x16x16xf32, #tpu.memory_space<any>>) target(%arg5 : memref<3x16x16xf32, #tpu.memory_space<vmem>>) target_semaphore(%4 : memref<!tpu.dma_semaphore, #tpu.memory_space<semaphore_mem>>)
    %c0_i32_1 = arith.constant 0 : i32
    %c0_i32_2 = arith.constant 0 : i32
    %5 = tpu.memref_slice %arg1[%1, %0, %c0_i32_2] : memref<6x16x16xf32, #tpu.memory_space<any>> -> memref<3x16x16xf32, #tpu.memory_space<any>>
    %6 = tpu.memref_slice %arg6[%c0_i32_1] : memref<2x!tpu.dma_semaphore, #tpu.memory_space<semaphore_mem>> -> memref<1x!tpu.dma_semaphore, #tpu.memory_space<semaphore_mem>>
    %7 = tpu.memref_squeeze %6 : memref<1x!tpu.dma_semaphore, #tpu.memory_space<semaphore_mem>> -> memref<!tpu.dma_semaphore, #tpu.memory_space<semaphore_mem>>
    tpu.wait_dma2 semaphore(%7 : memref<!tpu.dma_semaphore, #tpu.memory_space<semaphore_mem>>) src(%5 : memref<3x16x16xf32, #tpu.memory_space<any>>) dst(%arg5 : memref<3x16x16xf32, #tpu.memory_space<vmem>>)
    %c0_3 = arith.constant 0 : index
    %c0_4 = arith.constant 0 : index
    %c0_5 = arith.constant 0 : index
    %8 = vector.load %arg5[%c0_3, %c0_4, %c0_5] : memref<3x16x16xf32, #tpu.memory_space<vmem>>, vector<3x16x16xf32>
    %c0_6 = arith.constant 0 : index
    %c0_7 = arith.constant 0 : index
    %c0_8 = arith.constant 0 : index
    %9 = vector.load %arg3[%c0_6, %c0_7, %c0_8] : memref<3x16x16xf32, #tpu.memory_space<vmem>>, vector<3x16x16xf32>
    %10 = arith.addf %8, %9 : vector<3x16x16xf32>
    %c0_9 = arith.constant 0 : index
    %c0_10 = arith.constant 0 : index
    %c0_11 = arith.constant 0 : index
    %11 = vector.load %arg5[%c0_9, %c0_10, %c0_11] : memref<3x16x16xf32, #tpu.memory_space<vmem>>, vector<3x16x16xf32>
    tpu.vector_store %arg5[%c0_9, %c0_10, %c0_11], %10 {strides = array<i32>} : memref<3x16x16xf32, #tpu.memory_space<vmem>>, vector<3x16x16xf32>,
    %c1_i32 = arith.constant 1 : i32
    %c0_i32_12 = arith.constant 0 : i32
    %12 = tpu.memref_slice %arg4[%1, %0, %c0_i32_12] : memref<6x16x16xf32, #tpu.memory_space<any>> -> memref<3x16x16xf32, #tpu.memory_space<any>>
    %13 = tpu.memref_slice %arg6[%c1_i32] : memref<2x!tpu.dma_semaphore, #tpu.memory_space<semaphore_mem>> -> memref<1x!tpu.dma_semaphore, #tpu.memory_space<semaphore_mem>>
    %14 = tpu.memref_squeeze %13 : memref<1x!tpu.dma_semaphore, #tpu.memory_space<semaphore_mem>> -> memref<!tpu.dma_semaphore, #tpu.memory_space<semaphore_mem>>
    tpu.enqueue_dma source(%arg5 : memref<3x16x16xf32, #tpu.memory_space<vmem>>) target(%12 : memref<3x16x16xf32, #tpu.memory_space<any>>) target_semaphore(%14 : memref<!tpu.dma_semaphore, #tpu.memory_space<semaphore_mem>>)
    %c1_i32_13 = arith.constant 1 : i32
    %c0_i32_14 = arith.constant 0 : i32
    %15 = tpu.memref_slice %arg4[%1, %0, %c0_i32_14] : memref<6x16x16xf32, #tpu.memory_space<any>> -> memref<3x16x16xf32, #tpu.memory_space<any>>
    %16 = tpu.memref_slice %arg6[%c1_i32_13] : memref<2x!tpu.dma_semaphore, #tpu.memory_space<semaphore_mem>> -> memref<1x!tpu.dma_semaphore, #tpu.memory_space<semaphore_mem>>
    %17 = tpu.memref_squeeze %16 : memref<1x!tpu.dma_semaphore, #tpu.memory_space<semaphore_mem>> -> memref<!tpu.dma_semaphore, #tpu.memory_space<semaphore_mem>>
    tpu.wait_dma2 semaphore(%17 : memref<!tpu.dma_semaphore, #tpu.memory_space<semaphore_mem>>) src(%arg5 : memref<3x16x16xf32, #tpu.memory_space<vmem>>) dst(%15 : memref<3x16x16xf32, #tpu.memory_space<any>>)
    return
  }
  func.func @transform_1(%arg0: i32) -> i32 {
    %c0_i32 = arith.constant 0 : i32
    %c0_i32_0 = arith.constant 0 : i32
    return %c0_i32 : i32
  }
  func.func @transform_2(%arg0: i32) -> (i32, i32, i32) {
    %c0_i32 = arith.constant 0 : i32
    %c0_i32_0 = arith.constant 0 : i32
    %c0_i32_1 = arith.constant 0 : i32
    %c0_i32_2 = arith.constant 0 : i32
    return %c0_i32, %c0_i32_0, %c0_i32_1 : i32, i32, i32
  }
}

</mosaic_0001>

<bundles_post_ra>
// kernel: tpu_custom_call.1
= control target key start
LH: loop header
LB: loop body
LE: loop exit
PB: predicated region body
PF: predicated region fallthrough
CT: control target
= control target key end

     0   :  { %s260_s14 = smov 0   ;;  %s332_s0 = inlined_call_operand.hbm [shape: f32[6,16,16], index: 0, kind: input, shape index: {}, may-alias: {0,3}]   ;;  %s333_s1 = inlined_call_operand.<no memory space> [shape: s32[1], index: 1, kind: input, shape index: {}]   ;;  %s334_s2 = inlined_call_operand.vmem [shape: f32[3,16,16], index: 2, kind: input, shape index: {}]   ;;  %s335_s3 = inlined_call_operand.hbm [shape: f32[6,16,16], index: 3, kind: output, shape index: {}, may-alias: {0,3}]  }
   0x1   :  { %8 = sst [smem:[#allocation4]] %s333_s1 }
   0x2 LB: > { %s157_s15 = sadd.s32 4294967295, %s234_s14   ;;  %p161_p0 = scmp.lt.s32.totalorder %s234_s14, 1  ;;  %s234_s14 = sphi %s260_s14, %s14_s14  }
   0x3   : > { %s69_s16 = sld [smem:[#allocation4]] (!%p161_p0)  ;;  %s162_s17 = smul.u32 (!%p161_p0), 48, %s157_s15 }
   0x4   : > { %63 = sbr.rel (%p161_p0) target bundleno = 55 (0x37), region = 28  ;;  %s236_s18 = smov (!%p161_p0), [#allocation2]  }
   0x5   : > { %s82_s19 = sshll.u32 (!%p161_p0), %s236_s18, 4  ;;  %s178_s27 = scalar_lea.hbm (!%p161_p0), %s332_s0, 1536  ;;  %s267_s19 = int_to_ptr.vmem [resolvable:$true] %s82_s19 }
   0x9   : > { %s72_s20 = sadd.s32 (!%p161_p0), %s162_s17, %s69_s16 }
   0xa   : > { %s269_s1 = sshll.u32 (!%p161_p0), %s72_s20, 4 }
   0xb   : > { %s74_s23 = scalar_lea.hbm %s332_s0, %s269_s1 }
   0xc   : > { %s176_s24 = scalar_lea.hbm %s74_s23, 768  ;;  %p179_p2 = scmp.lt.u32.totalorder %s74_s23, %s332_s0 }
   0xd   : > { %p177_p1 = scmp.ne.s32.totalorder %s74_s23, %s176_s24  ;;  %p180_p3 = scmp.lt.u32.totalorder %s178_s27, %s176_s24 }
   0xe   : > { %p182_p5 = scmp.lt.u32.totalorder %s176_s24, %s74_s23 }
   0xf   : > { %p181_p4 = por %p180_p3, %p179_p2 }
  0x11   : > { %p183_p6 = por %p182_p5, %p181_p4 }
  0x13   : > { %p184_p7 = pnand %p183_p6, %p177_p1 }
  0x15   : > { %187 = shalt.err (!%p184_p7)  }
  0x16   : > { %s188_s30 = scalar_lea.vmem %s267_s19, 768  ;;  %p193_p9 = scmp.lt.s32.totalorder %s267_s19, %s267_s19 }
  0x17   : > { %p189_p8 = scmp.ne.s32.totalorder %s267_s19, %s188_s30  ;;  %p194_p10 = scmp.lt.s32.totalorder %s188_s30, %s188_s30 }
  0x19   : > { %p195_p11 = por %p194_p10, %p193_p9 }
  0x1b   : > { %p285_p12 = pnand %p195_p11, %p189_p8 }
  0x1d   : > { %199 = shalt.err (!%p285_p12)  }
  0x1e   : > { %85 = dma.hbm_to_vmem [thread:$0]  %s74_s23, 768, %s267_s19, [#allocation3] }
  0x1f   : > { %228 = dma.done.wait [#allocation3], 768 }
  0x20   : > { %229 = vsyncadd [#allocation3], 4294966528  ;;  %v90_v0 = vld [vmem:[#allocation2] sm:$0xff]  ;;  %vm108_vm0 = vcmask 130048   ;;  %v91_v2 = vld [vmem:[#allocation2 + $0x8] sm:$0xff]  ;;  %s116_s21 = scalar_lea.hbm %s335_s3, %s269_s1 }
  0x21   : > { %v96_v1 = vld [vmem:[%s334_s2] sm:$0xff]  ;;  %v97_v4 = vld [vmem:[%s334_s2 + $0x8] sm:$0xff]  ;;  %v92_v5 = vld [vmem:[#allocation2 + $0x10] sm:$0xff] }
  0x22   : > { %v102_v3 = vadd.f32 %v96_v1, %v90_v0  ;;  %v98_v6 = vld [vmem:[%s334_s2 + $0x10] sm:$0xff]  ;;  %v103_v7 = vadd.f32 %v97_v4, %v91_v2  ;;  %v93_v9 = vld [vmem:[#allocation2 + $0x18] sm:$0xff]  ;;  %v94_v11 = vld [vmem:[#allocation2 + $0x20] sm:$0xff] }
  0x23   : > { %v104_v8 = vadd.f32 %v98_v6, %v92_v5  ;;  %v99_v10 = vld [vmem:[%s334_s2 + $0x18] sm:$0xff]  ;;  %v100_v13 = vld [vmem:[%s334_s2 + $0x20] sm:$0xff]  ;;  %v95_v14 = vld [vmem:[#allocation2 + $0x28] sm:$0xff] }
  0x24   : > { %109 = vst.msk [vmem:[#allocation2] sm:$0xff] %vm108_vm0, %v102_v3  ;;  %v105_v12 = vadd.f32 %v99_v10, %v93_v9  ;;  %v101_v15 = vld [vmem:[%s334_s2 + $0x28] sm:$0xff]  ;;  %110 = vst.msk [vmem:[#allocation2 + $0x8] sm:$0xff] %vm108_vm0, %v103_v7  ;;  %v106_v16 = vadd.f32 %v100_v13, %v94_v11 }
  0x25   : > { %111 = vst.msk [vmem:[#allocation2 + $0x10] sm:$0xff] %vm108_vm0, %v104_v8  ;;  %v107_v17 = vadd.f32 %v101_v15, %v95_v14 }
  0x26   : > { %112 = vst.msk [vmem:[#allocation2 + $0x18] sm:$0xff] %vm108_vm0, %v105_v12  ;;  %113 = vst.msk [vmem:[#allocation2 + $0x20] sm:$0xff] %vm108_vm0, %v106_v16 }
  0x27   : > { %114 = vst.msk [vmem:[#allocation2 + $0x28] sm:$0xff] %vm108_vm0, %v107_v17 }
  0x28   : > { %211 = shalt.err (!%p285_p12)  }
  0x29   : > { %s212_s22 = scalar_lea.hbm %s116_s21, 768  ;;  %s214_s25 = scalar_lea.hbm %s335_s3, 1536 }
  0x2a   : > { %p213_p13 = scmp.ne.s32.totalorder %s116_s21, %s212_s22  ;;  %p215_p0 = scmp.lt.u32.totalorder %s116_s21, %s335_s3 }
  0x2b   : > { %p216_p1 = scmp.lt.u32.totalorder %s214_s25, %s212_s22  ;;  %p218_p3 = scmp.lt.u32.totalorder %s212_s22, %s116_s21 }
  0x2d   : > { %p217_p2 = por %p216_p1, %p215_p0 }
  0x2f   : > { %p219_p4 = por %p218_p3, %p217_p2 }
  0x31   : > { %p220_p5 = pnand %p219_p4, %p213_p13 }
  0x33   : > { %223 = shalt.err (!%p220_p5)  }
  0x34   : > { %128 = dma.vmem_to_hbm [thread:$0]  %s267_s19, 768, %s116_s21, [#allocation3 + $0x1] }
  0x35   : > { %230 = dma.done.wait [#allocation3 + $0x1], 768 }
  0x36   : > { %231 = vsyncadd [#allocation3 + $0x1], 4294966528 }
  0x37 PF: > { %s14_s14 = sadd.s32 1, %s234_s14  }
  0x38   : > { %p11_p6 = scmp.ge.s32.totalorder %s14_s14, 3  }
  0x3a   :  { %13 = sbr.rel (!%p11_p6) target bundleno = 2 (0x2), region = 51 }
  0x41   :  { %131 = vsyncmov [#allocation3] }
  0x44   :  { %s132_s1 = vpop.sfrf %131 }
  0x45   :  { %p165_p7 = scmp.ne.s32.totalorder %s132_s1, 0 }
  0x47   :  { %136 = shalt.err (%p165_p7)  }
  0x48   :  { %138 = vsyncmov [#allocation3 + $0x1] }
  0x4b   :  { %s139_s28 = vpop.sfrf %138 }
  0x4c   :  { %p166_p8 = scmp.ne.s32.totalorder %s139_s28, 0 }
  0x4e   :  { %143 = shalt.err (%p166_p8)  }

</bundles_post_ra>
